<compile_context>
chip_gen: v7x
topology: tpu7x:2x2x1
jax: 0.10.0
libtpu: 0.0.40
codegen_flags: <defaults>
</compile_context>

<pallas_src>
import jax
import jax.numpy as jnp
from jax.experimental import pallas as pl
from jax.experimental.pallas import tpu as pltpu

# ---- config (mirrors the TorchModel config dict) -------------------------------
HIDDEN = 32
VOCAB = 30
CLASS_NUM = 5
KERNEL_SIZE = 3
PAD = (KERNEL_SIZE - 1) // 2
BATCH = 2
SEQ = 8
CDIM = 128                  # lane-dense contraction dim (K*VOCAB = 90 -> padded to 128)
C_PAD = 128                 # lane-dense classifier width (logits live in cols [:CLASS_NUM])


# ---- the single fused Pallas kernel ---------------------------------------------
def fused_forward_kernel(tgt_ref, tbl_ref, wc_ref, bc_ref, out_ref):
    # tgt_ref : (K, B*S, 1)  int32, VMEM  shifted one-hot targets: k*VOCAB + tok[b, s+k-PAD],
    #                                     or -1 where the shifted position falls off the sequence
    # tbl_ref : (CDIM, 2H)   f32,   VMEM  fused (embedding @ conv-tap) table, cols = [cnn | gate],
    #                                     rows >= K*VOCAB are zero (contraction padded to 128)
    # wc_ref  : (H, C_PAD)   f32,   VMEM  classifier weight, zero-padded to 128 lanes
    # bc_ref  : (1, C_PAD)   f32,   VMEM  classifier bias,   zero-padded
    # out_ref : (B, C_PAD)   f32,   VMEM  padded logits (cols >= CLASS_NUM are zero)
    BS = BATCH * SEQ

    # Shifted multi-hot LHS: pure VPU (one iota + K compares + ORs), no scalar loop,
    # no scratch, no concats.  Sentinel -1 never matches a column in [0, 128).
    col = jax.lax.broadcasted_iota(jnp.int32, (BS, CDIM), 1)
    hit = (col == tgt_ref[0])
    for k in range(1, KERNEL_SIZE):
        hit = hit | (col == tgt_ref[k])
    onehot = hit.astype(jnp.float32)                                      # (B*S, 128)

    # Embedding gather + im2col + both conv branches + all taps: ONE MXU matmul.
    ab = jnp.dot(onehot, tbl_ref[...], preferred_element_type=jnp.float32)  # (B*S, 2H)
    g = ab[:, :HIDDEN] * jax.nn.sigmoid(ab[:, HIDDEN:])                    # GatedCNN gate
    # TODO(synk): on v6e/v7x a 256-wide table (cnn half in lanes 0..31, gate half in
    # lanes 128..159) would make this split a free vreg selection; kept 64-wide so the
    # same kernel stays one MXU pass on v5e's 128-wide MXU.

    # MaxPool1d over the sequence, per batch (static sublane slices, no reshape).
    pooled = jnp.concatenate(
        [jnp.max(g[b * SEQ:(b + 1) * SEQ, :], axis=0, keepdims=True) for b in range(BATCH)],
        axis=0)                                                           # (B, H)

    # Classifier: lane-dense 128-wide store.
    out_ref[...] = (jnp.dot(pooled, wc_ref[...], preferred_element_type=jnp.float32)
                    + bc_ref[...])


# ---- one-time weight re-layout (hoisted out of the per-forward path) ------------
def prepare_params(params):
    """Fold embedding + per-tap conv weights of both branches into one (128, 2H) table.

    Must be re-run if the underlying weights change (usage contract).
    """
    K, H, V, C = KERNEL_SIZE, HIDDEN, VOCAB, CLASS_NUM
    E = params["embedding"]                                   # (V, H), row 0 is zero (padding_idx=0)
    blocks = []
    for k in range(K):
        wa_k = params["cnn_w"][:, :, k].T                     # (H_in, H_out) per-tap matmul weight
        wb_k = params["gate_w"][:, :, k].T
        blocks.append(jnp.concatenate([E @ wa_k, E @ wb_k], axis=1))   # (V, 2H)
    tbl = jnp.concatenate(blocks, axis=0)                     # (K*V, 2H) = (90, 64)
    tbl = jnp.zeros((CDIM, 2 * H), jnp.float32).at[:K * V, :].set(tbl)  # pad contraction to 128
    wc = jnp.zeros((H, C_PAD), jnp.float32).at[:, :C].set(params["cls_w"].T)
    bc = jnp.zeros((1, C_PAD), jnp.float32).at[0, :C].set(params["cls_b"])
    return dict(tbl=tbl, wc=wc, bc=bc)


def _build_targets(tokens):
    """Tiny int32 index prep: (K, B*S, 1) shifted targets k*VOCAB + tok[b, s+k-PAD], -1 off-seq."""
    t = tokens.astype(jnp.int32)                              # (B, S)
    outs = []
    for k in range(KERNEL_SIZE):
        d = k - PAD
        if d < 0:
            shifted = jnp.concatenate(
                [jnp.full((BATCH, -d), -1, jnp.int32), t[:, :SEQ + d]], axis=1)
        elif d > 0:
            shifted = jnp.concatenate(
                [t[:, d:], jnp.full((BATCH, d), -1, jnp.int32)], axis=1)
        else:
            shifted = t
        tgt = jnp.where(shifted >= 0, shifted + k * VOCAB, -1)
        outs.append(tgt.reshape(BATCH * SEQ, 1))
    return jnp.stack(outs, axis=0)                            # (K, B*S, 1)


@jax.jit
def torch_model_forward(tokens, prep):
    """tokens: (B, S) int32 -> logits (B, CLASS_NUM) float32, one fused pallas_call."""
    tgt = _build_targets(tokens)
    out = pl.pallas_call(
        fused_forward_kernel,
        out_shape=jax.ShapeDtypeStruct((BATCH, C_PAD), jnp.float32),
        in_specs=[
            pl.BlockSpec(memory_space=pltpu.MemorySpace.VMEM),   # shifted one-hot targets
            pl.BlockSpec(memory_space=pltpu.MemorySpace.VMEM),   # fused emb⊗conv table
            pl.BlockSpec(memory_space=pltpu.MemorySpace.VMEM),   # padded classifier weight
            pl.BlockSpec(memory_space=pltpu.MemorySpace.VMEM),   # padded classifier bias
        ],
        out_specs=pl.BlockSpec(memory_space=pltpu.MemorySpace.VMEM),
    )(tgt, prep["tbl"], prep["wc"], prep["bc"])
    return out[:, :CLASS_NUM]
    # TODO(synk): for large batches add a grid over 128-256 row tiles of the one-hot LHS with
    # compiler_params=pltpu.CompilerParams(dimension_semantics=("parallel",)) so v7x's two
    # TensorCores split the work and the MXU sees full tiles; unnecessary at B=2, S=8.


# ---- pure-JAX reference (for correctness check) ---------------------------------
def ref_forward(tokens, params):
    emb = params["embedding"][tokens]
    xp = jnp.pad(emb, ((0, 0), (PAD, PAD), (0, 0)))
    S = tokens.shape[1]

    def conv(w):  # w: (out, in, K), same padding, no bias
        return sum(
            jnp.einsum("bsh,oh->bso", xp[:, k:k + S, :], w[:, :, k])
            for k in range(KERNEL_SIZE)
        )

    a = conv(params["cnn_w"])
    b = conv(params["gate_w"])
    g = a * jax.nn.sigmoid(b)
    pooled = jnp.max(g, axis=1)
    return pooled @ params["cls_w"].T + params["cls_b"]


def init_params(key):
    ks = jax.random.split(key, 5)
    emb = 0.02 * jax.random.normal(ks[0], (VOCAB, HIDDEN), jnp.float32)
    emb = emb.at[0].set(0.0)  # padding_idx=0
    cnn_w = 0.1 * jax.random.normal(ks[1], (HIDDEN, HIDDEN, KERNEL_SIZE), jnp.float32)
    gate_w = 0.1 * jax.random.normal(ks[2], (HIDDEN, HIDDEN, KERNEL_SIZE), jnp.float32)
    cls_w = 0.1 * jax.random.normal(ks[3], (CLASS_NUM, HIDDEN), jnp.float32)
    cls_b = 0.1 * jax.random.normal(ks[4], (CLASS_NUM,), jnp.float32)
    return dict(embedding=emb, cnn_w=cnn_w, gate_w=gate_w, cls_w=cls_w, cls_b=cls_b)


if __name__ == "__main__":
    key = jax.random.PRNGKey(0)
    pkey, tkey = jax.random.split(key)
    params = init_params(pkey)
    tokens = jax.random.randint(tkey, (BATCH, SEQ), 0, VOCAB, dtype=jnp.int32)

    prep = prepare_params(params)                      # one-time weight re-layout
    logits = jax.block_until_ready(torch_model_forward(tokens, prep))
    ref = jax.block_until_ready(ref_forward(tokens, params))

    assert logits.shape == (BATCH, CLASS_NUM)
    assert jnp.allclose(logits, ref, atol=1e-4, rtol=1e-4), (logits, ref)
    print("KERNEL_OK")
</pallas_src>

<mosaic_0001>
module attributes {stable_mosaic.version = 11 : i64} {
  func.func @fused_forward_kernel(%arg0: memref<3x16x1xi32, #tpu.memory_space<vmem>>, %arg1: memref<128x64xf32, #tpu.memory_space<vmem>>, %arg2: memref<32x128xf32, #tpu.memory_space<vmem>>, %arg3: memref<1x128xf32, #tpu.memory_space<vmem>>, %arg4: memref<2x128xf32, #tpu.memory_space<vmem>>) attributes {dimension_semantics = [], scalar_prefetch = 0 : i64, scratch_operands = 0 : i64, tpu.core_type = #tpu.core_type<tc>} {
    %0 = tpu.iota {dimensions = array<i32: 1>} : vector<16x128xi32>
    %c0 = arith.constant 0 : index
    %c0_0 = arith.constant 0 : index
    %c0_1 = arith.constant 0 : index
    %1 = vector.load %arg0[%c0, %c0_0, %c0_1] : memref<3x16x1xi32, #tpu.memory_space<vmem>>, vector<1x16x1xi32>
    %2 = vector.shape_cast %1 : vector<1x16x1xi32> to vector<16x1xi32>
    %3 = vector.broadcast %2 : vector<16x1xi32> to vector<16x128xi32>
    %4 = arith.cmpi eq, %0, %3 : vector<16x128xi32>
    %c1 = arith.constant 1 : index
    %c0_2 = arith.constant 0 : index
    %c0_3 = arith.constant 0 : index
    %5 = vector.load %arg0[%c1, %c0_2, %c0_3] : memref<3x16x1xi32, #tpu.memory_space<vmem>>, vector<1x16x1xi32>
    %6 = vector.shape_cast %5 : vector<1x16x1xi32> to vector<16x1xi32>
    %7 = vector.broadcast %6 : vector<16x1xi32> to vector<16x128xi32>
    %8 = arith.cmpi eq, %0, %7 : vector<16x128xi32>
    %9 = arith.ori %4, %8 : vector<16x128xi1>
    %c2 = arith.constant 2 : index
    %c0_4 = arith.constant 0 : index
    %c0_5 = arith.constant 0 : index
    %10 = vector.load %arg0[%c2, %c0_4, %c0_5] : memref<3x16x1xi32, #tpu.memory_space<vmem>>, vector<1x16x1xi32>
    %11 = vector.shape_cast %10 : vector<1x16x1xi32> to vector<16x1xi32>
    %12 = vector.broadcast %11 : vector<16x1xi32> to vector<16x128xi32>
    %13 = arith.cmpi eq, %0, %12 : vector<16x128xi32>
    %14 = arith.ori %9, %13 : vector<16x128xi1>
    %15 = arith.extui %14 : vector<16x128xi1> to vector<16x128xi32>
    %16 = arith.sitofp %15 : vector<16x128xi32> to vector<16x128xf32>
    %c0_6 = arith.constant 0 : index
    %c0_7 = arith.constant 0 : index
    %17 = vector.load %arg1[%c0_6, %c0_7] : memref<128x64xf32, #tpu.memory_space<vmem>>, vector<128x64xf32>
    %cst = arith.constant dense<0.000000e+00> : vector<16x64xf32>
    %18 = tpu.matmul %16, %17, %cst {dimension_numbers = #tpu.dot_dimension_numbers<[1], [0], [0], [1], [0, 0, 1, 1], [], []>} : vector<16x128xf32>, vector<128x64xf32>, vector<16x64xf32> -> vector<16x64xf32>
    %19 = vector.extract_strided_slice %18 {offsets = [0, 0], sizes = [16, 32], strides = [1, 1]} : vector<16x64xf32> to vector<16x32xf32>
    %20 = vector.extract_strided_slice %18 {offsets = [0, 32], sizes = [16, 32], strides = [1, 1]} : vector<16x64xf32> to vector<16x32xf32>
    %21 = arith.negf %20 : vector<16x32xf32>
    %22 = math.exp %21 : vector<16x32xf32>
    %cst_8 = arith.constant 1.000000e+00 : f32
    %23 = vector.broadcast %cst_8 : f32 to vector<16x32xf32>
    %24 = arith.addf %23, %22 : vector<16x32xf32>
    %25 = arith.divf %23, %24 : vector<16x32xf32>
    %26 = arith.mulf %19, %25 : vector<16x32xf32>
    %27 = vector.extract_strided_slice %26 {offsets = [0, 0], sizes = [8, 32], strides = [1, 1]} : vector<16x32xf32> to vector<8x32xf32>
    %cst_9 = arith.constant dense<0xFF800000> : vector<32xf32>
    %28 = vector.multi_reduction <maximumf>, %27, %cst_9 [0] : vector<8x32xf32> to vector<32xf32>
    %29 = vector.shape_cast %28 : vector<32xf32> to vector<1x32xf32>
    %30 = vector.extract_strided_slice %26 {offsets = [8, 0], sizes = [8, 32], strides = [1, 1]} : vector<16x32xf32> to vector<8x32xf32>
    %cst_10 = arith.constant dense<0xFF800000> : vector<32xf32>
    %31 = vector.multi_reduction <maximumf>, %30, %cst_10 [0] : vector<8x32xf32> to vector<32xf32>
    %32 = vector.shape_cast %31 : vector<32xf32> to vector<1x32xf32>
    %33 = tpu.concatenate %29, %32 in 0 : vector<1x32xf32>, vector<1x32xf32> -> vector<2x32xf32>
    %c0_11 = arith.constant 0 : index
    %c0_12 = arith.constant 0 : index
    %34 = vector.load %arg2[%c0_11, %c0_12] : memref<32x128xf32, #tpu.memory_space<vmem>>, vector<32x128xf32>
    %cst_13 = arith.constant dense<0.000000e+00> : vector<2x128xf32>
    %35 = tpu.matmul %33, %34, %cst_13 {dimension_numbers = #tpu.dot_dimension_numbers<[1], [0], [0], [1], [0, 0, 1, 1], [], []>} : vector<2x32xf32>, vector<32x128xf32>, vector<2x128xf32> -> vector<2x128xf32>
    %c0_14 = arith.constant 0 : index
    %c0_15 = arith.constant 0 : index
    %36 = vector.load %arg3[%c0_14, %c0_15] : memref<1x128xf32, #tpu.memory_space<vmem>>, vector<1x128xf32>
    %37 = vector.broadcast %36 : vector<1x128xf32> to vector<2x128xf32>
    %38 = arith.addf %35, %37 : vector<2x128xf32>
    %c0_16 = arith.constant 0 : index
    %c0_17 = arith.constant 0 : index
    %39 = vector.load %arg4[%c0_16, %c0_17] : memref<2x128xf32, #tpu.memory_space<vmem>>, vector<2x128xf32>
    tpu.vector_store %arg4[%c0_16, %c0_17], %38 {strides = array<i32>} : memref<2x128xf32, #tpu.memory_space<vmem>>, vector<2x128xf32>,
    return
  }
}

</mosaic_0001>

<bundles_post_ra>
// kernel: torch_model_forward.1
= control target key start
LH: loop header
LB: loop body
LE: loop exit
PB: predicated region body
PF: predicated region fallthrough
CT: control target
= control target key end

     0   :  { %v449_v2 = vmov 0   ;;  %s577_s0 = inlined_call_operand.vmem [shape: s32[3,16,1], index: 0, kind: input, shape index: {}]   ;;  %s578_s1 = inlined_call_operand.vmem [shape: f32[128,64], index: 1, kind: input, shape index: {}]   ;;  %s579_s2 = inlined_call_operand.vmem [shape: f32[32,128], index: 2, kind: input, shape index: {}]   ;;  %s580_s3 = inlined_call_operand.vmem [shape: f32[1,128], index: 3, kind: input, shape index: {}]   ;;  %s581_s4 = inlined_call_operand.hbm [shape: f32[2,128], index: 4, kind: output, shape index: {}]  }
   0x1   :  { %v21_v0 = vld [vmem:[%s577_s0 + $0x8] sm:$0xff]  ;;  %v20_v1 = vld [vmem:[%s577_s0] sm:$0xff]  ;;  %416 = vset.pattern.permute.xlu1 %v449_v2  ;;  %415 = vset.pattern.permute.xlu0 %v449_v2  ;;  %v62_v5 = vld [vmem:[%s578_s1 + $0x10] sm:$0xff] }
   0x2   :  { %26 = vperm.xlu1 %416, %v21_v0   ;;  %23 = vperm.xlu0 %415, %v20_v1   ;;  %v60_v3 = vld [vmem:[%s578_s1] sm:$0xff]  ;;  %v61_v4 = vld [vmem:[%s578_s1 + $0x8] sm:$0xff]  ;;  %v290_v6 = vld [vmem:[%s577_s0 + $0x18] sm:$0xff] }
   0x3   :  { %v289_v7 = vld [vmem:[%s577_s0 + $0x10] sm:$0xff]  ;;  %v370_v8 = vpack.c.bf16 %v61_v4, %v60_v3  ;;  %v63_v9 = vld [vmem:[%s578_s1 + $0x18] sm:$0xff]  ;;  %v64_v11 = vld [vmem:[%s578_s1 + $0x20] sm:$0xff] }
   0x4   :  { %v374_v10 = vpack.c.bf16 %v63_v9, %v62_v5  ;;  %v65_v12 = vld [vmem:[%s578_s1 + $0x28] sm:$0xff]  ;;  %v291_v14 = vld [vmem:[%s577_s0 + $0x20] sm:$0xff] }
   0x5   :  { %371 = vmatprep.subr.bf16.mxu0 %v370_v8  ;;  %v292_v13 = vld [vmem:[%s577_s0 + $0x28] sm:$0xff] }
   0x6   :  { %37 = vperm.xlu1 %416, %v290_v6   ;;  %34 = vperm.xlu0 %415, %v289_v7  }
   0x7   :  { %373 = vmatpush3.bf16.msra.mxu0 %v370_v8 }
   0x8   :  { %9 = vsyncpa [#allocation3], 0  ;;  %375 = vmatprep.subr.bf16.mxu0 %v374_v10  ;;  %v378_v15 = vpack.c.bf16 %v65_v12, %v64_v11  ;;  %v66_v16 = vld [vmem:[%s578_s1 + $0x30] sm:$0xff]  ;;  %v67_v17 = vld [vmem:[%s578_s1 + $0x38] sm:$0xff]  ;;  %v18_v31 = vlaneseq  ;;  %v450_v39 = vmov 1.0   ;;  %v451_v51 = vmov 0.0|0.0  }
   0x9   :  { %v382_v18 = vpack.c.bf16 %v67_v17, %v66_v16  ;;  %v68_v19 = vld [vmem:[%s578_s1 + $0x40] sm:$0xff]  ;;  %v69_v20 = vld [vmem:[%s578_s1 + $0x48] sm:$0xff]  ;;  %v70_v22 = vld [vmem:[%s578_s1 + $0x50] sm:$0xff]  ;;  %402 = vmatprep.subr.bf16.mxu1 %v451_v51  ;;  %s452_s13 = smov 96   ;;  %vm453_vm10 = vmmov 0   ;;  %v454_v57 = vmov 0.0  }
   0xa   :  { %50 = vperm.xlu1 %416, %v292_v13   ;;  %47 = vperm.xlu0 %415, %v291_v14   ;;  %v386_v21 = vpack.c.bf16 %v69_v20, %v68_v19  ;;  %v71_v23 = vld [vmem:[%s578_s1 + $0x58] sm:$0xff]  ;;  %v72_v25 = vld [vmem:[%s578_s1 + $0x60] sm:$0xff]  ;;  %v73_v26 = vld [vmem:[%s578_s1 + $0x68] sm:$0xff]  ;;  %v19_v34 = vand.u32 127, %v18_v31  ;;  %vm173_vm11 = vcmask 261120   ;;  %vm188_vm12 = vcmask 1040384  }
   0xb   :  { %377 = vmatpush3.bf16.msra.mxu0 %v374_v10  ;;  %v390_v24 = vpack.c.bf16 %v71_v23, %v70_v22  ;;  %v394_v27 = vpack.c.bf16 %v73_v26, %v72_v25  ;;  %v74_v28 = vld [vmem:[%s578_s1 + $0x70] sm:$0xff]  ;;  %v75_v29 = vld [vmem:[%s578_s1 + $0x78] sm:$0xff]  ;;  %v190_v48 = vld [vmem:[%s579_s2] sm:$0xff]  ;;  %367 = vmatprep.mubr.msk.f32.mxu1 %vm453_vm10, %v454_v57  ;;  %s455_s15 = smov [#allocation2]  }
   0xc   :  { %379 = vmatprep.subr.bf16.mxu0 %v378_v15  ;;  %v398_v30 = vpack.c.bf16 %v75_v29, %v74_v28  ;;  %v191_v49 = vld [vmem:[%s579_s2 + $0x8] sm:$0xff]  ;;  %v192_v52 = vld [vmem:[%s579_s2 + $0x10] sm:$0xff]  ;;  %v193_v53 = vld [vmem:[%s579_s2 + $0x18] sm:$0xff]  ;;  %s281_s16 = sshll.u32 %s455_s15, 4  ;;  %s282_s16 = int_to_ptr.vmem [resolvable:$true] %s281_s16 }
   0xd   :  { %v403_v50 = vpack.c.bf16 %v191_v49, %v190_v48  ;;  %v406_v55 = vpack.c.bf16 %v193_v53, %v192_v52  ;;  %v299_v13 = vld [vmem:[%s580_s3] ss:$0 sm:$0xff]  ;;  %s425_s17 = scalar_lea.vmem %s282_s16, 32  ;;  %p430_p1 = scmp.lt.s32.totalorder %s282_s16, %s282_s16 }
   0xe   :  { %p426_p0 = scmp.ne.s32.totalorder %s282_s16, %s425_s17  ;;  %p431_p2 = scmp.lt.s32.totalorder %s425_s17, %s425_s17 }
   0xf   :  { %381 = vmatpush3.bf16.msra.mxu0 %v378_v15  ;;  %404 = vmatpush3.bf16.msra.mxu1 %v403_v50 }
  0x10   :  { %383 = vmatprep.subr.bf16.mxu0 %v382_v18  ;;  %405 = vmatprep.subr.bf16.mxu1 %v451_v51  ;;  %p432_p3 = por %p431_p2, %p430_p1 }
  0x12   :  { %p433_p4 = pnand %p432_p3, %p426_p0 }
  0x13   :  { %385 = vmatpush3.bf16.msra.mxu0 %v382_v18  ;;  %407 = vmatpush3.bf16.msra.mxu1 %v406_v55 }
  0x14   :  { %387 = vmatprep.subr.bf16.mxu0 %v386_v21 }
  0x17   :  { %389 = vmatpush3.bf16.msra.mxu0 %v386_v21 }
  0x18   :  { %391 = vmatprep.subr.bf16.mxu0 %v390_v24 }
  0x1b   :  { %393 = vmatpush3.bf16.msra.mxu0 %v390_v24 }
  0x1c   :  { %395 = vmatprep.subr.bf16.mxu0 %v394_v27 }
  0x1f   :  { %397 = vmatpush3.bf16.msra.mxu0 %v394_v27 }
  0x20   :  { %399 = vmatprep.subr.bf16.mxu0 %v398_v30 }
  0x23   :  { %401 = vmatpush3.bf16.msra.mxu0 %v398_v30 }
  0x81   :  { %v27_v32 = vpop.permute.xlu1 %26  ;;  %v24_v33 = vpop.permute.xlu0 %23 }
  0x82   :  { %vm29_vm2 = vcmp.eq.s32.totalorder %v19_v34, %v27_v32  ;;  %vm28_vm3 = vcmp.eq.s32.totalorder %v19_v34, %v24_v33 }
  0x85   :  { %v38_v35 = vpop.permute.xlu1 %37  ;;  %v35_v36 = vpop.permute.xlu0 %34 }
  0x86   :  { %vm40_vm0 = vcmp.eq.s32.totalorder %v19_v34, %v38_v35  ;;  %vm39_vm1 = vcmp.eq.s32.totalorder %v19_v34, %v35_v36 }
  0x87   :  { %vm42_vm4 = vmor %vm29_vm2, %vm40_vm0 }
  0x88   :  { %vm41_vm7 = vmor %vm28_vm3, %vm39_vm1 }
  0x89   :  { %v51_v37 = vpop.permute.xlu1 %50  ;;  %v48_v38 = vpop.permute.xlu0 %47 }
  0x8a   :  { %vm53_vm5 = vcmp.eq.s32.totalorder %v19_v34, %v51_v37  ;;  %vm52_vm6 = vcmp.eq.s32.totalorder %v19_v34, %v48_v38 }
  0x8b   :  { %vm55_vm8 = vmor %vm42_vm4, %vm53_vm5 }
  0x8c   :  { %vm54_vm9 = vmor %vm41_vm7, %vm52_vm6 }
  0x8d   :  { %356 = vmatprep.mubr.msk.f32.mxu0 %vm54_vm9, %v450_v39 }
  0x8e   :  { %357 = vmatmul.mubr.msk.f32.vlgmr.msra.gmra.mrb[0].mxu0 %vm55_vm8, %v450_v39 }
 0x161   :  { %v358_v40 = vpop.f32.mrb[0].mxu0 }
 0x162   :  { %v298_v41 = vmul.f32 -1.442695, %v358_v40  ;;  %v142_v42 = vpop.f32.mrb[1].mxu0 }
 0x163   :  { %v297_v43 = vmul.f32 -1.442695, %v142_v42 }
 0x164   :  { %417 = vpow2.f32 %v298_v41 }
 0x165   :  { %419 = vpow2.f32 %v297_v43 }
 0x16e   :  { %v418_v44 = vpop.eup %417 }
 0x16f   :  { %v420_v45 = vpop.eup %419  ;;  %v158_v46 = vadd.f32 1.0, %v418_v44 }
 0x170   :  { %v157_v47 = vadd.f32 1.0, %v420_v45 }
 0x171   :  { %421 = vrcp.f32 %v158_v46 }
 0x172   :  { %423 = vrcp.f32 %v157_v47 }
 0x17b   :  { %v422_v54 = vpop.eup %421 }
 0x17c   :  { %v424_v56 = vpop.eup %423  ;;  %167 = vrot.lane.b32.xlu1 %v422_v54, %s452_s13 }
 0x17d   :  { %165 = vrot.lane.b32.xlu0 %v424_v56, %s452_s13 }
 0x1ee   :  { %v168_v58 = vpop.permute.xlu1 %167 }
 0x1ef   :  { %v172_v59 = vmul.f32 %v358_v40, %v168_v58  ;;  %v166_v60 = vpop.permute.xlu0 %165 }
 0x1f0   :  { %v171_v61 = vmul.f32 %v166_v60, %v142_v42 }
 0x1f1   :  { %v181_v62 = vsel %vm173_vm11, %v172_v59, -inf }
 0x1f2   :  { %v182_v63 = vrot.slane %v181_v62, 4  ;;  %v174_v0 = vsel %vm173_vm11, %v171_v61, -inf }
 0x1f3   :  { %v175_v1 = vrot.slane %v174_v0, 4 }
 0x1f4   :  { %v183_v2 = vmax.f32 %v181_v62, %v182_v63 }
 0x1f5   :  { %v176_v3 = vmax.f32 %v174_v0, %v175_v1 }
 0x1f6   :  { %v184_v4 = vrot.slane %v183_v2, 2 }
 0x1f7   :  { %v177_v5 = vrot.slane %v176_v3, 2 }
 0x1f8   :  { %v185_v6 = vmax.f32 %v183_v2, %v184_v4 }
 0x1f9   :  { %v178_v7 = vmax.f32 %v176_v3, %v177_v5 }
 0x1fa   :  { %v186_v8 = vrot.slane %v185_v6, 1 }
 0x1fb   :  { %v179_v9 = vrot.slane %v178_v7, 1 }
 0x1fc   :  { %v187_v10 = vmax.f32 %v185_v6, %v186_v8 }
 0x1fd   :  { %v180_v11 = vmax.f32 %v178_v7, %v179_v9 }
 0x1ff   :  { %v189_v12 = vsel %vm188_vm12, %v180_v11, %v187_v10 }
 0x200   :  { %368 = vmatmul.mubr.msk.f32.vlgmr.msra.gmra.mrb[0].mxu1 %vm173_vm11, %v189_v12 }
 0x2d3   :  { %v270_v14 = vpop.f32.mrb[0].mxu1 }
 0x2d4   :  { %v271_v15 = vadd.f32 %v299_v13, %v270_v14  ;;  %v369_v16 = vpop.f32.mrb[1].mxu1 }
 0x2d6   :  { %274 = vst [vmem:[#allocation2] sm:$0x3] %v271_v15 }
 0x2d7   :  { %436 = shalt.err (!%p433_p4)
}
 0x2d8   :  { %s437_s19 = scalar_lea.hbm %s581_s4, 32 }
 0x2d9   :  { %p438_p5 = scmp.ne.s32.totalorder %s581_s4, %s437_s19  ;;  %p441_p6 = scmp.lt.u32.totalorder %s437_s19, %s581_s4 }
 0x2db   :  { %p443_p7 = pnand %p441_p6, %p438_p5 }
 0x2dd   :  { %446 = shalt.err (!%p443_p7)
}
 0x2de   :  { %284 = dma.vmem_to_hbm [thread:$0]  %s282_s16, 32, %s581_s4, [#allocation3]  }
 0x2df   :  { %447 = dma.done.wait [#allocation3], 32  }
 0x2e0   :  { %448 = vsyncadd [#allocation3], 4294967264 }
 0x2e1   :  { %288 = vsyncpa [#allocation3], 1 }

</bundles_post_ra>
